<compile_context>
chip_gen: v7x
topology: tpu7x:2x2x1
jax: 0.10.0
libtpu: 0.0.40
codegen_flags: <defaults>
</compile_context>

<pallas_src>
import jax
import jax.numpy as jnp
from jax.experimental import pallas as pl
from jax.experimental.pallas import tpu as pltpu

EPS = 0.1
_NEG_PAD = -1e30  # vocab pad value: exp() underflows to 0, stays finite


def _round_up(x, m):
    return (x + m - 1) // m * m


def _make_kernel(v_real, v_pad, eps):
    lo = eps / v_real
    hi = 1.0 - eps + lo
    lane_masked = v_pad != v_real  # static: extra select only for ragged vocab

    def kernel(logits_ref, targets_ref, out_ref):
        x = logits_ref[...].astype(jnp.float32)        # (TM, Vpad)
        tgt = targets_ref[...]                          # (TM, 1) int32, -1 => invalid
        valid = tgt >= 0                                # padded / tail rows -> False

        # numerically stable log-sum-exp over the vocab (lane) axis
        m = jnp.max(x, axis=-1, keepdims=True)
        lse = jnp.log(jnp.sum(jnp.exp(x - m), axis=-1, keepdims=True)) + m

        # fused gather + smoothing: sum_v w_v * x_v
        col = jax.lax.broadcasted_iota(jnp.int32, x.shape, 1)
        if lane_masked:
            w = jnp.where(col == tgt, hi, jnp.where(col < v_real, lo, 0.0))
        else:
            w = jnp.where(col == tgt, hi, lo)
        wx = jnp.sum(w * x, axis=-1, keepdims=True)     # (TM, 1)

        # where (not multiply) so garbage in the partial edge block can't NaN
        per_tok = jnp.where(valid, lse - wx, 0.0)

        # lane-dense partial-sum tile; wrapper reads [i, 0, 0] and reduces
        out_ref[...] = jnp.full(out_ref.shape, jnp.sum(per_tok), dtype=jnp.float32)

    return kernel


def label_smoothed_ce(inputs, targets, lengths, eps=EPS):
    """inputs: (N, T, V) float, targets: (N, T) int, lengths: (N,) int -> scalar."""
    N, T, V = inputs.shape
    M = N * T
    logits = inputs.reshape(M, V)                       # keep native dtype (bf16 ok)

    # -1 sentinel marks padded positions (replaces a f32 mask stream).
    pos = jnp.arange(T, dtype=jnp.int32)[None, :]
    valid = pos < lengths[:, None].astype(jnp.int32)
    tgt = jnp.where(valid, targets.astype(jnp.int32), -1).reshape(M, 1)

    # Pad the vocab (lane) axis once to a multiple of 128 -> unmasked lane ops.
    V_pad = _round_up(V, 128)
    if V_pad != V:
        logits = jnp.pad(logits, ((0, 0), (0, V_pad - V)), constant_values=_NEG_PAD)

    itemsize = jnp.dtype(logits.dtype).itemsize
    row_mult = {1: 32, 2: 16}.get(itemsize, 8)          # packed-sublane alignment

    # Generation-aware VMEM budgeting (64 MiB on v7x, 128 MiB on v5e/v6e).
    try:
        vmem_cap = int(getattr(pltpu.get_tpu_info(), "vmem_capacity_bytes",
                               64 * 1024 * 1024))
    except Exception:  # conservative fallback
        vmem_cap = 64 * 1024 * 1024
    vmem_limit = min(vmem_cap * 3 // 4, 100 * 1024 * 1024)

    # Working set per row ~ double-buffered native tile + f32 cast/temporaries.
    per_row = V_pad * (2 * itemsize + 2 * 4)
    tm = int(0.8 * vmem_limit) // max(1, per_row)
    tm = max(row_mult, min(tm, 2048, _round_up(M, row_mult)))
    tm = (tm // row_mult) * row_mult

    num_blocks = pl.cdiv(M, tm)
    m_pad = num_blocks * tm
    if m_pad != M:
        # Only the tiny targets array is padded; the logits tail block is
        # masked in-kernel (no HBM re-copy of the [M, V] logits).
        tgt = jnp.pad(tgt, ((0, m_pad - M), (0, 0)), constant_values=-1)

    partials = pl.pallas_call(
        _make_kernel(V, V_pad, eps),
        out_shape=jax.ShapeDtypeStruct((num_blocks, 8, 128), jnp.float32),
        grid=(num_blocks,),
        in_specs=[
            pl.BlockSpec((tm, V_pad), lambda i: (i, 0)),
            pl.BlockSpec((tm, 1), lambda i: (i, 0)),
        ],
        out_specs=pl.BlockSpec((1, 8, 128), lambda i: (i, 0, 0)),
        compiler_params=pltpu.CompilerParams(
            dimension_semantics=("parallel",),
            vmem_limit_bytes=vmem_limit,
        ),
    )(logits, tgt)

    total = jnp.sum(partials[:, 0, 0])
    # Exact parity with the reference: count = sum of the clipped valid mask.
    count = jnp.sum(jnp.minimum(lengths, T)).astype(jnp.float32)
    return total / jnp.maximum(count, 1.0)


def _reference(inputs, targets, lengths):
    """Plain-JAX reference mirroring the PyTorch semantics."""
    N, T, V = inputs.shape
    logp = jax.nn.log_softmax(inputs.astype(jnp.float32), axis=-1)
    onehot = jax.nn.one_hot(targets, V, dtype=jnp.float32)
    tvec = onehot * (1.0 - EPS) + EPS / V
    per_tok = jnp.sum(-tvec * logp, axis=-1)            # (N, T)
    mask = (jnp.arange(T)[None, :] < lengths[:, None]).astype(jnp.float32)
    return jnp.sum(per_tok * mask) / jnp.sum(mask)


if __name__ == "__main__":
    key = jax.random.PRNGKey(0)
    N, T, V = 2, 8, 32
    k1, k2 = jax.random.split(key)
    inputs = jax.random.normal(k1, (N, T, V), dtype=jnp.float32)
    targets = jax.random.randint(k2, (N, T), 0, V, dtype=jnp.int32)
    lengths = jnp.array([8, 5], dtype=jnp.int32)

    loss = label_smoothed_ce(inputs, targets, lengths)
    jax.block_until_ready(loss)

    ref = _reference(inputs, targets, lengths)
    assert jnp.allclose(loss, ref, rtol=1e-5, atol=1e-5), (loss, ref)
    print("KERNEL_OK")
</pallas_src>

<mosaic_0001>
module attributes {stable_mosaic.version = 11 : i64} {
  func.func @kernel(%arg0: i32, %arg1: memref<16x128xf32, #tpu.memory_space<vmem>>, %arg2: memref<16x1xi32, #tpu.memory_space<vmem>>, %arg3: memref<1x8x128xf32, #tpu.memory_space<vmem>>) attributes {dimension_semantics = [#tpu.dimension_semantics<parallel>], iteration_bounds = array<i64: 1>, scalar_prefetch = 0 : i64, scratch_operands = 0 : i64, tpu.core_type = #tpu.core_type<tc>, window_params = [{transform_indices = @transform_0, window_bounds = array<i64: 16, 128>}, {transform_indices = @transform_1, window_bounds = array<i64: 16, 1>}, {transform_indices = @transform_2, window_bounds = array<i64: 1, 8, 128>}]} {
    %c0 = arith.constant 0 : index
    %c0_0 = arith.constant 0 : index
    %0 = vector.load %arg1[%c0, %c0_0] : memref<16x128xf32, #tpu.memory_space<vmem>>, vector<16x128xf32>
    %c0_1 = arith.constant 0 : index
    %c0_2 = arith.constant 0 : index
    %1 = vector.load %arg2[%c0_1, %c0_2] : memref<16x1xi32, #tpu.memory_space<vmem>>, vector<16x1xi32>
    %c0_i32 = arith.constant 0 : i32
    %2 = vector.broadcast %c0_i32 : i32 to vector<16x1xi32>
    %3 = arith.cmpi sge, %1, %2 : vector<16x1xi32>
    %cst = arith.constant dense<0xFF800000> : vector<16xf32>
    %4 = vector.multi_reduction <maximumf>, %0, %cst [1] : vector<16x128xf32> to vector<16xf32>
    %5 = vector.shape_cast %4 : vector<16xf32> to vector<16x1xf32>
    %6 = vector.broadcast %5 : vector<16x1xf32> to vector<16x128xf32>
    %7 = arith.subf %0, %6 : vector<16x128xf32>
    %8 = math.exp %7 : vector<16x128xf32>
    %cst_3 = arith.constant dense<0.000000e+00> : vector<16xf32>
    %9 = vector.multi_reduction <add>, %8, %cst_3 [1] : vector<16x128xf32> to vector<16xf32>
    %10 = vector.shape_cast %9 : vector<16xf32> to vector<16x1xf32>
    %11 = math.log %10 : vector<16x1xf32>
    %12 = arith.addf %11, %5 : vector<16x1xf32>
    %13 = tpu.iota {dimensions = array<i32: 1>} : vector<16x128xi32>
    %14 = vector.broadcast %1 : vector<16x1xi32> to vector<16x128xi32>
    %15 = arith.cmpi eq, %13, %14 : vector<16x128xi32>
    %c32_i32 = arith.constant 32 : i32
    %16 = vector.broadcast %c32_i32 : i32 to vector<16x128xi32>
    %17 = arith.cmpi slt, %13, %16 : vector<16x128xi32>
    %cst_4 = arith.constant 3.125000e-03 : f32
    %cst_5 = arith.constant 0.000000e+00 : f32
    %18 = vector.broadcast %cst_4 : f32 to vector<16x128xf32>
    %19 = vector.broadcast %cst_5 : f32 to vector<16x128xf32>
    %20 = arith.select %17, %18, %19 : vector<16x128xi1>, vector<16x128xf32>
    %cst_6 = arith.constant 0.903124988 : f32
    %21 = vector.broadcast %cst_6 : f32 to vector<16x128xf32>
    %22 = arith.select %15, %21, %20 : vector<16x128xi1>, vector<16x128xf32>
    %23 = arith.mulf %22, %0 : vector<16x128xf32>
    %cst_7 = arith.constant dense<0.000000e+00> : vector<16xf32>
    %24 = vector.multi_reduction <add>, %23, %cst_7 [1] : vector<16x128xf32> to vector<16xf32>
    %25 = vector.shape_cast %24 : vector<16xf32> to vector<16x1xf32>
    %26 = arith.subf %12, %25 : vector<16x1xf32>
    %cst_8 = arith.constant 0.000000e+00 : f32
    %27 = vector.broadcast %cst_8 : f32 to vector<16x1xf32>
    %28 = arith.select %3, %26, %27 : vector<16x1xi1>, vector<16x1xf32>
    %29 = vector.shape_cast %28 : vector<16x1xf32> to vector<1x16x1xf32>
    %cst_9 = arith.constant dense<0.000000e+00> : vector<1xf32>
    %30 = vector.multi_reduction <add>, %29, %cst_9 [1, 2] : vector<1x16x1xf32> to vector<1xf32>
    %31 = vector.shape_cast %30 : vector<1xf32> to vector<1x1x1xf32>
    %32 = vector.extract %31[0, 0, 0] : f32 from vector<1x1x1xf32>
    %33 = vector.broadcast %32 : f32 to vector<1x8x128xf32>
    %c0_10 = arith.constant 0 : index
    %c0_11 = arith.constant 0 : index
    %c0_12 = arith.constant 0 : index
    %34 = vector.load %arg3[%c0_10, %c0_11, %c0_12] : memref<1x8x128xf32, #tpu.memory_space<vmem>>, vector<1x8x128xf32>
    tpu.vector_store %arg3[%c0_10, %c0_11, %c0_12], %33 {strides = array<i32>} : memref<1x8x128xf32, #tpu.memory_space<vmem>>, vector<1x8x128xf32>,
    return
  }
  func.func @transform_0(%arg0: i32) -> (i32, i32) {
    %c0_i32 = arith.constant 0 : i32
    %c0_i32_0 = arith.constant 0 : i32
    return %arg0, %c0_i32 : i32, i32
  }
  func.func @transform_1(%arg0: i32) -> (i32, i32) {
    %c0_i32 = arith.constant 0 : i32
    %c0_i32_0 = arith.constant 0 : i32
    return %arg0, %c0_i32 : i32, i32
  }
  func.func @transform_2(%arg0: i32) -> (i32, i32, i32) {
    %c0_i32 = arith.constant 0 : i32
    %c0_i32_0 = arith.constant 0 : i32
    %c0_i32_1 = arith.constant 0 : i32
    return %arg0, %c0_i32, %c0_i32_0 : i32, i32, i32
  }
}

</mosaic_0001>

<bundles_post_ra>
// kernel: tpu_custom_call.1
= control target key start
LH: loop header
LB: loop body
LE: loop exit
PB: predicated region body
PF: predicated region fallthrough
CT: control target
= control target key end

     0   :  { %v130_v2 = vmov 0   ;;  %s172_s0 = inlined_call_operand.vmem [shape: f32[16,128], index: 0, kind: input, shape index: {}]   ;;  %s173_s1 = inlined_call_operand.vmem [shape: s32[16,1], index: 1, kind: input, shape index: {}]   ;;  %s174_s2 = inlined_call_operand.hbm [shape: f32[1,8,128], index: 2, kind: output, shape index: {}]  }
   0x1   :  { %v12_v0 = vld [vmem:[%s172_s0] sm:$0xff]  ;;  %96 = vset.pattern.permute.xlu1 %v130_v2 }
   0x2   :  { %v14_v1 = vld [vmem:[%s173_s1] sm:$0xff]  ;;  %18 = vmax.xlane.f32.xlu0 %v12_v0 }
   0x3   :  { %7 = vsyncpa [#allocation3], 0  ;;  %v13_v3 = vld [vmem:[%s172_s0 + $0x8] sm:$0xff]  ;;  %41 = vperm.xlu1 %96, %v14_v1   ;;  %97 = vset.pattern.permute.xlu0 %v130_v2  ;;  %v38_v5 = vlaneseq  ;;  %v131_v14 = vmov 0.0   ;;  %vm16_vm3 = vcmp.ge.s32.totalorder %v14_v1, 0  ;;  %vm62_vm5 = vcmask 7168  }
   0x4   :  { %v15_v4 = vld [vmem:[%s173_s1 + $0x8] sm:$0xff]  ;;  %s132_s0 = smov [#allocation2]  }
   0x5   :  { %v39_v9 = vand.u32 127, %v38_v5  ;;  %vm17_vm4 = vcmp.ge.s32.totalorder %v15_v4, 0  ;;  %s83_s1 = sshll.u32 %s132_s0, 4  ;;  %s84_s1 = int_to_ptr.vmem [resolvable:$true] %s83_s1 }
   0x6   :  { %20 = vmax.xlane.f32.xlu0 %v13_v3  ;;  %s106_s18 = scalar_lea.vmem %s84_s1, 128  ;;  %p111_p1 = scmp.lt.s32.totalorder %s84_s1, %s84_s1 }
   0x7   :  { %44 = vperm.xlu1 %96, %v15_v4   ;;  %vm48_vm0 = vcmp.lt.s32.totalorder %v39_v9, 32  ;;  %p107_p0 = scmp.ne.s32.totalorder %s84_s1, %s106_s18  ;;  %p112_p2 = scmp.lt.s32.totalorder %s106_s18, %s106_s18 }
   0x8   :  { %v49_v15 = vsel %vm48_vm0, 0.003125, %v131_v14 }
   0x9   :  { %p113_p3 = por %p112_p2, %p111_p1 }
   0xb   :  { %p114_p4 = pnand %p113_p3, %p107_p0 }
  0x82   :  { %v42_v12 = vpop.permute.xlu1 %41 }
  0x83   :  { %vm46_vm1 = vcmp.eq.s32.totalorder %v39_v9, %v42_v12 }
  0x84   :  { %v50_v17 = vsel %vm46_vm1, 0.903125, %v49_v15 }
  0x85   :  { %v52_v19 = vmul.f32 %v50_v17, %v12_v0 }
  0x86   :  { %v45_v16 = vpop.permute.xlu1 %44 }
  0x87   :  { %vm47_vm2 = vcmp.eq.s32.totalorder %v39_v9, %v45_v16 }
  0x88   :  { %v51_v20 = vsel %vm47_vm2, 0.903125, %v49_v15 }
  0x89   :  { %v53_v22 = vmul.f32 %v51_v20, %v13_v3 }
  0x8f   :  { %v19_v6 = vpop.xlane.xlu0 %18 }
  0x90   :  { %v22_v7 = vsub.f32 %v12_v0, %v19_v6 }
  0x92   :  { %v24_v8 = vmul.f32 1.442695, %v22_v7 }
  0x93   :  { %v21_v10 = vpop.xlane.xlu0 %20 }
  0x94   :  { %98 = vpow2.f32 %v24_v8  ;;  %v23_v11 = vsub.f32 %v13_v3, %v21_v10 }
  0x96   :  { %v26_v13 = vmul.f32 1.442695, %v23_v11 }
  0x98   :  { %100 = vpow2.f32 %v26_v13 }
  0x9e   :  { %v99_v18 = vpop.eup %98 }
  0x9f   :  { %28 = vadd.xlane.f32.xlu0 %v99_v18 }
  0xa2   :  { %v101_v21 = vpop.eup %100 }
  0xa3   :  { %30 = vadd.xlane.f32.xlu1 %v101_v21  ;;  %54 = vadd.xlane.f32.xlu0 %v52_v19 }
  0xa7   :  { %56 = vadd.xlane.f32.xlu0 %v53_v22 }
 0x12c   :  { %v29_v23 = vpop.xlane.xlu0 %28 }
 0x12d   :  { %102 = vlog2.f32 %v29_v23 }
 0x130   :  { %v31_v24 = vpop.xlane.xlu1 %30  ;;  %v55_v27 = vpop.xlane.xlu0 %54 }
 0x131   :  { %104 = vlog2.f32 %v31_v24 }
 0x134   :  { %v57_v33 = vpop.xlane.xlu0 %56 }
 0x137   :  { %v103_v25 = vpop.eup %102 }
 0x138   :  { %v33_v26 = vmul.f32 0.6931472, %v103_v25 }
 0x13a   :  { %v36_v28 = vadd.f32 %v33_v26, %v19_v6 }
 0x13b   :  { %v105_v29 = vpop.eup %104 }
 0x13c   :  { %v35_v30 = vmul.f32 0.6931472, %v105_v29  ;;  %v58_v31 = vsub.f32 %v36_v28, %v55_v27 }
 0x13e   :  { %v37_v32 = vadd.f32 %v35_v30, %v21_v10  ;;  %v60_v34 = vsel %vm16_vm3, %v58_v31, 0.0 }
 0x13f   :  { %v63_v37 = vsel %vm62_vm5, %v60_v34, 0.0 }
 0x140   :  { %v59_v35 = vsub.f32 %v37_v32, %v57_v33 }
 0x142   :  { %v61_v36 = vsel %vm17_vm4, %v59_v35, 0.0 }
 0x143   :  { %v64_v38 = vsel %vm62_vm5, %v61_v36, 0.0 }
 0x144   :  { %v65_v39 = vadd.f32 %v64_v38, %v63_v37 }
 0x146   :  { %66 = vadd.xlane.f32.xlu0 %v65_v39 }
 0x1d3   :  { %v67_v40 = vpop.xlane.xlu0 %66 }
 0x1d4   :  { %v68_v41 = vrot.slane %v67_v40, 4 }
 0x1d6   :  { %v69_v42 = vadd.f32 %v68_v41, %v67_v40 }
 0x1d8   :  { %v70_v43 = vrot.slane %v69_v42, 2 }
 0x1da   :  { %v71_v44 = vadd.f32 %v70_v43, %v69_v42 }
 0x1dc   :  { %v72_v45 = vrot.slane %v71_v44, 1 }
 0x1de   :  { %v73_v46 = vadd.f32 %v72_v45, %v71_v44 }
 0x1e0   :  { %91 = vpush %v73_v46 }
 0x211   :  { %s92_s17 = spop %91 }
 0x212   :  { %v75_v47 = vstv %s92_s17 }
 0x213   :  { %76 = vst [vmem:[#allocation2] sm:$0xff] %v75_v47 }
 0x214   :  { %117 = shalt.err (!%p114_p4)
}
 0x215   :  { %s118_s21 = scalar_lea.hbm %s174_s2, 128 }
 0x216   :  { %p119_p5 = scmp.ne.s32.totalorder %s174_s2, %s118_s21  ;;  %p122_p6 = scmp.lt.u32.totalorder %s118_s21, %s174_s2 }
 0x218   :  { %p124_p7 = pnand %p122_p6, %p119_p5 }
 0x21a   :  { %127 = shalt.err (!%p124_p7)
}
 0x21b   :  { %86 = dma.vmem_to_hbm [thread:$0]  %s84_s1, 128, %s174_s2, [#allocation3]  }
 0x21c   :  { %128 = dma.done.wait [#allocation3], 128  }
 0x21d   :  { %129 = vsyncadd [#allocation3], 4294967168 }
 0x21e   :  { %90 = vsyncpa [#allocation3], 1 }

</bundles_post_ra>
